<compile_context>
chip_gen: v6e
topology: v6e:2x2x1
jax: 0.10.0
libtpu: 0.0.40
codegen_flags: <defaults>
</compile_context>

<pallas_src>
import functools
import itertools

import numpy as np

import jax
import jax.numpy as jnp
from jax.experimental import pallas as pl
from jax.experimental.pallas import tpu as pltpu

try:  # optional; only used on the host for the assignment step
    from scipy.optimize import linear_sum_assignment as _scipy_lsa
except Exception:  # pragma: no cover
    _scipy_lsa = None

_NF = 16               # padded per-box feature width: cx,cy,w,h,x0,y0,x1,y1,area,(pad)
_LANE = 128
_SUBLANE = 8
_MAX_TILE_N = 1024     # per review: 512-1024-row tiles reach ~85% of HBM roofline
_VMEM_LIMIT = 64 * 1024 * 1024   # explicit limit (v5e default is only 16 MiB)
_VMEM_BUDGET = 40 * 1024 * 1024  # conservative budget used to cap tile_n
_EPS = 1e-12


def _round_up(x, m):
    return ((x + m - 1) // m) * m


def _recip(x):
    """EUP approximate reciprocal + one Newton-Raphson step (~full f32 precision).

    The Newton step on inv_union / inv_enc could be dropped if profiling shows the
    VALU slot saturating (approx recip lives on the otherwise-idle EUP slot)."""
    r = pl.reciprocal(x, approx=True)
    return r * (2.0 - x * r)


def _cost_kernel(logits_ref, pfeat_ref, tfeat_ref, onehot_ref, out_ref,
                 *, w_class, w_bbox, w_giou):
    # ---- class cost: softmax "gather" as MXU matmul with a one-hot target matrix ----
    logits = logits_ref[...]                                    # [TN, C] f32
    m = jnp.max(logits, axis=-1, keepdims=True)
    e = jnp.exp(logits - m)                                     # EUP
    sum_e = jnp.sum(e, axis=-1, keepdims=True)                  # [TN, 1]
    onehot = onehot_ref[...].astype(jnp.float32)                # bf16 resident -> f32 (exact)
    scores = jnp.dot(e, onehot,
                     preferred_element_type=jnp.float32)        # [TN, Tp] (MXU)
    cost_class = -(scores * _recip(sum_e))                      # normalize after the matmul

    # ---- box features (precomputed once in the wrapper) ----
    p = pfeat_ref[...]                                          # [TN, 16]
    t = tfeat_ref[...]                                          # [16, Tp]
    cx_a, cy_a, w_a, h_a = p[:, 0:1], p[:, 1:2], p[:, 2:3], p[:, 3:4]
    x0a, y0a, x1a, y1a = p[:, 4:5], p[:, 5:6], p[:, 6:7], p[:, 7:8]
    area_a = p[:, 8:9]
    cx_b, cy_b, w_b, h_b = t[0:1, :], t[1:2, :], t[2:3, :], t[3:4, :]
    x0b, y0b, x1b, y1b = t[4:5, :], t[5:6, :], t[6:7, :], t[7:8, :]
    area_b = t[8:9, :]

    # L1 cdist on cxcywh
    cost_bbox = (jnp.abs(cx_a - cx_b) + jnp.abs(cy_a - cy_b)
                 + jnp.abs(w_a - w_b) + jnp.abs(h_a - h_b))     # [TN, Tp]

    # generalized IoU cost
    inter_w = jnp.maximum(jnp.minimum(x1a, x1b) - jnp.maximum(x0a, x0b), 0.0)
    inter_h = jnp.maximum(jnp.minimum(y1a, y1b) - jnp.maximum(y0a, y0b), 0.0)
    inter = inter_w * inter_h                                   # [TN, Tp]
    union = area_a + area_b - inter
    enc_w = jnp.maximum(jnp.maximum(x1a, x1b) - jnp.minimum(x0a, x0b), 0.0)
    enc_h = jnp.maximum(jnp.maximum(y1a, y1b) - jnp.minimum(y0a, y0b), 0.0)
    enc_area = enc_w * enc_h
    inv_union = _recip(jnp.maximum(union, _EPS))                # eps: no inf/NaN on degenerate boxes
    inv_enc = _recip(jnp.maximum(enc_area, _EPS))
    # cost_giou = -giou = 1 - inter/union - union/enc_area
    cost_giou = 1.0 - inter * inv_union - union * inv_enc

    out_ref[...] = w_bbox * cost_bbox + w_class * cost_class + w_giou * cost_giou


def _box_features(boxes):
    """cxcywh -> [cx,cy,w,h,x0,y0,x1,y1,area] per box (tiny XLA op, done once)."""
    cx, cy, w, h = boxes[:, 0], boxes[:, 1], boxes[:, 2], boxes[:, 3]
    x0, y0, x1, y1 = cx - 0.5 * w, cy - 0.5 * h, cx + 0.5 * w, cy + 0.5 * h
    area = (x1 - x0) * (y1 - y0)
    return jnp.stack([cx, cy, w, h, x0, y0, x1, y1, area], axis=-1).astype(jnp.float32)


def _choose_tiling(n, max_tile):
    """Pick (tile_n, n_pad). Prefer multiple-of-8 divisors of the 8-aligned row count
    (no row padding), ideally with an even number of grid steps so v7x's two
    TensorCores get balanced work; otherwise pad rows up to a large tile."""
    n_pad8 = _round_up(max(n, 1), _SUBLANE)
    max_tile = max(_SUBLANE, min(max_tile, _MAX_TILE_N))
    if n_pad8 <= _SUBLANE:
        return n_pad8, n_pad8
    half = _round_up(-(-n_pad8 // 2), _SUBLANE)
    cap = min(max_tile, half)                      # keep >=2 grid steps
    best_any = best_even = None
    for cand in range(_SUBLANE, cap + 1, _SUBLANE):
        if n_pad8 % cand == 0:
            best_any = cand
            if (n_pad8 // cand) % 2 == 0:
                best_even = cand
    tile = best_even if (best_even is not None and 2 * best_even >= (best_any or 0)) else best_any
    if tile is not None and (tile >= 256 or tile >= cap):
        return tile, n_pad8                        # exact divisor: no row padding
    return cap, _round_up(n_pad8, cap)             # small row pad, big tile wins


def hungarian_cost_matrix(pred_logits, pred_boxes, target_ids, target_boxes,
                          cost_class=1.0, cost_bbox=1.0, cost_giou=1.0):
    """Returns the PADDED cost matrix [n_pad, t_pad] (f32); valid region is
    [:bs*num_queries, :num_total_targets]. No device-side de-pad copy is made."""
    bs, nq, num_classes = pred_logits.shape
    n = bs * nq
    t = int(target_boxes.shape[0])
    t_pad = _round_up(max(t, 1), _LANE)            # lane-dense output / resident blocks

    # VMEM-aware cap on tile_n (double-buffered N-tiles + resident target blocks).
    resident_bytes = 2 * (num_classes * t_pad * 2 + _NF * t_pad * 4)
    per_row_bytes = 2 * 4 * (num_classes + _NF + t_pad)
    row_budget = max(_VMEM_BUDGET - resident_bytes, _SUBLANE * per_row_bytes)
    max_tile = (row_budget // per_row_bytes) // _SUBLANE * _SUBLANE
    tile_n, n_pad = _choose_tiling(n, max_tile)

    # No class-dim padding of the logits (block last dim == array last dim).
    logits = pred_logits.reshape(n, num_classes).astype(jnp.float32)
    if n_pad > n:
        logits = jnp.pad(logits, ((0, n_pad - n), (0, 0)))

    pfeat = _box_features(pred_boxes.reshape(n, 4))
    pfeat = jnp.pad(pfeat, ((0, n_pad - n), (0, _NF - pfeat.shape[1])))          # [n_pad, 16]

    tfeat = _box_features(target_boxes.reshape(t, 4))
    tfeat_t = jnp.pad(tfeat, ((0, t_pad - t), (0, _NF - tfeat.shape[1]))).T      # [16, Tp]

    # bf16 one-hot (0/1 exact): halves resident VMEM / HBM traffic of the largest
    # constant block; cast back to f32 inside the kernel before the MXU matmul.
    onehot = jax.nn.one_hot(target_ids, num_classes, dtype=jnp.bfloat16)         # [t, C]
    onehot_t = jnp.pad(onehot, ((0, t_pad - t), (0, 0))).T                       # [C, Tp]

    kernel = functools.partial(_cost_kernel, w_class=float(cost_class),
                               w_bbox=float(cost_bbox), w_giou=float(cost_giou))

    return pl.pallas_call(
        kernel,
        out_shape=jax.ShapeDtypeStruct((n_pad, t_pad), jnp.float32),
        grid=(n_pad // tile_n,),
        in_specs=[
            pl.BlockSpec((tile_n, num_classes), lambda i: (i, 0)),   # logits tile (full C)
            pl.BlockSpec((tile_n, _NF), lambda i: (i, 0)),           # pred box features tile
            pl.BlockSpec((_NF, t_pad), lambda i: (0, 0)),            # target features: resident
            pl.BlockSpec((num_classes, t_pad), lambda i: (0, 0)),    # bf16 one-hot: resident
        ],
        out_specs=pl.BlockSpec((tile_n, t_pad), lambda i: (i, 0)),
        compiler_params=pltpu.CompilerParams(
            dimension_semantics=("parallel",),     # shards N-tiles across v7x's 2 TCs
            vmem_limit_bytes=_VMEM_LIMIT),
    )(logits, pfeat, tfeat_t, onehot_t)


def _assignment(cost):
    """Rectangular linear-sum-assignment on a host numpy cost matrix."""
    if _scipy_lsa is not None:
        rows, cols = _scipy_lsa(cost)
        return np.asarray(rows, dtype=np.int32), np.asarray(cols, dtype=np.int32)
    # TODO(synk): the Hungarian algorithm is a sequential combinatorial solve with no
    # Pallas equivalent; this brute-force fallback is only viable for toy sizes.
    nq, nt = cost.shape
    best_rows, best_cost = None, None
    for perm in itertools.permutations(range(nq), nt):
        c = sum(float(cost[perm[j], j]) for j in range(nt))
        if best_cost is None or c < best_cost:
            best_cost, best_rows = c, perm
    pairs = sorted(zip(best_rows, range(nt)))
    return (np.asarray([p[0] for p in pairs], dtype=np.int32),
            np.asarray([p[1] for p in pairs], dtype=np.int32))


def hungarian_matcher(outputs, targets, cost_class=1.0, cost_bbox=1.0, cost_giou=1.0):
    target_ids = jnp.concatenate([v["labels"] for v in targets])
    target_bbox = jnp.concatenate([v["boxes"] for v in targets])
    bs, nq, _ = outputs["pred_logits"].shape
    t = int(target_bbox.shape[0])

    cost_padded = hungarian_cost_matrix(outputs["pred_logits"], outputs["pred_boxes"],
                                        target_ids, target_bbox,
                                        cost_class, cost_bbox, cost_giou)

    # Single bulk host transfer; per-batch slicing is host-side numpy (no extra HBM traffic).
    cost_host = np.asarray(jax.device_get(cost_padded))
    cost_host = cost_host[:bs * nq, :t].reshape(bs, nq, t)

    sizes = [int(v["boxes"].shape[0]) for v in targets]
    indices, start = [], 0
    for b, sz in enumerate(sizes):
        rows, cols = _assignment(cost_host[b, :, start:start + sz])
        indices.append((jnp.asarray(rows, dtype=jnp.int32),
                        jnp.asarray(cols, dtype=jnp.int32)))
        start += sz
    return indices, cost_padded


def _reference_cost(outputs, targets, cost_class=1.0, cost_bbox=1.0, cost_giou=1.0):
    """Pure-jnp reference of the cost matrix for correctness checking."""
    bs, nq, _ = outputs["pred_logits"].shape
    out_prob = jax.nn.softmax(outputs["pred_logits"].reshape(bs * nq, -1), axis=-1)
    out_bbox = outputs["pred_boxes"].reshape(bs * nq, 4)
    tgt_ids = jnp.concatenate([v["labels"] for v in targets])
    tgt_bbox = jnp.concatenate([v["boxes"] for v in targets])

    c_class = -out_prob[:, tgt_ids]
    c_bbox = jnp.sum(jnp.abs(out_bbox[:, None, :] - tgt_bbox[None, :, :]), axis=-1)

    def to_xyxy(b):
        cx, cy, w, h = b[:, 0], b[:, 1], b[:, 2], b[:, 3]
        return jnp.stack([cx - 0.5 * w, cy - 0.5 * h, cx + 0.5 * w, cy + 0.5 * h], axis=-1)

    a, b = to_xyxy(out_bbox), to_xyxy(tgt_bbox)
    area_a = (a[:, 2] - a[:, 0]) * (a[:, 3] - a[:, 1])
    area_b = (b[:, 2] - b[:, 0]) * (b[:, 3] - b[:, 1])
    lt = jnp.maximum(a[:, None, :2], b[None, :, :2])
    rb = jnp.minimum(a[:, None, 2:], b[None, :, 2:])
    wh = jnp.clip(rb - lt, 0.0)
    inter = wh[..., 0] * wh[..., 1]
    union = area_a[:, None] + area_b[None, :] - inter
    iou = inter / union
    lt_e = jnp.minimum(a[:, None, :2], b[None, :, :2])
    rb_e = jnp.maximum(a[:, None, 2:], b[None, :, 2:])
    wh_e = jnp.clip(rb_e - lt_e, 0.0)
    area_e = wh_e[..., 0] * wh_e[..., 1]
    giou = iou - (area_e - union) / area_e
    total = cost_bbox * c_bbox + cost_class * c_class + cost_giou * (-giou)
    return total.reshape(bs, nq, -1)


if __name__ == "__main__":
    key = jax.random.PRNGKey(0)
    bs, num_queries, num_classes = 2, 8, 32
    sizes = [3, 5]  # targets per batch element

    k1, k2, k3, k4 = jax.random.split(key, 4)
    pred_logits = jax.random.normal(k1, (bs, num_queries, num_classes), dtype=jnp.float32)
    # cxcywh boxes with positive sizes in (0, 1)
    pred_boxes = jax.random.uniform(k2, (bs, num_queries, 4), dtype=jnp.float32,
                                    minval=0.05, maxval=0.95)

    targets = []
    ks = jax.random.split(k3, len(sizes))
    kb = jax.random.split(k4, len(sizes))
    for i, sz in enumerate(sizes):
        labels = jax.random.randint(ks[i], (sz,), 0, num_classes)
        boxes = jax.random.uniform(kb[i], (sz, 4), dtype=jnp.float32,
                                   minval=0.05, maxval=0.95)
        targets.append({"labels": labels, "boxes": boxes})

    outputs = {"pred_logits": pred_logits, "pred_boxes": pred_boxes}

    indices, cost_padded = hungarian_matcher(outputs, targets)
    cost_padded = jax.block_until_ready(cost_padded)

    # correctness check against a pure-JAX reference (host-side slice of padded output)
    n = bs * num_queries
    t = sum(sizes)
    cost_host = np.asarray(jax.device_get(cost_padded))[:n, :t].reshape(bs, num_queries, t)
    ref = np.asarray(jax.device_get(_reference_cost(outputs, targets)))
    assert np.allclose(cost_host, ref, atol=5e-4, rtol=5e-4), "cost matrix mismatch"
    assert np.all(np.isfinite(cost_host)), "non-finite values in cost matrix"

    for rows, cols in indices:
        jax.block_until_ready(rows)
        jax.block_until_ready(cols)

    print("KERNEL_OK")
</pallas_src>

<mosaic_0001>
module attributes {stable_mosaic.version = 11 : i64} {
  func.func @_cost_kernel(%arg0: i32, %arg1: memref<8x32xf32, #tpu.memory_space<vmem>>, %arg2: memref<8x16xf32, #tpu.memory_space<vmem>>, %arg3: memref<16x128xf32, #tpu.memory_space<vmem>>, %arg4: memref<32x128xbf16, #tpu.memory_space<vmem>>, %arg5: memref<8x128xf32, #tpu.memory_space<vmem>>) attributes {dimension_semantics = [#tpu.dimension_semantics<parallel>], iteration_bounds = array<i64: 2>, scalar_prefetch = 0 : i64, scratch_operands = 0 : i64, tpu.core_type = #tpu.core_type<tc>, window_params = [{transform_indices = @transform_0, window_bounds = array<i64: 8, 32>}, {transform_indices = @transform_1, window_bounds = array<i64: 8, 16>}, {pipeline_mode = #tpu.pipeline_mode<synchronous>, transform_indices = @transform_2, window_bounds = array<i64: 16, 128>}, {pipeline_mode = #tpu.pipeline_mode<synchronous>, transform_indices = @transform_3, window_bounds = array<i64: 32, 128>}, {transform_indices = @transform_4, window_bounds = array<i64: 8, 128>}]} {
    %c0 = arith.constant 0 : index
    %c0_0 = arith.constant 0 : index
    %0 = vector.load %arg1[%c0, %c0_0] : memref<8x32xf32, #tpu.memory_space<vmem>>, vector<8x32xf32>
    %cst = arith.constant dense<0xFF800000> : vector<8xf32>
    %1 = vector.multi_reduction <maximumf>, %0, %cst [1] : vector<8x32xf32> to vector<8xf32>
    %2 = vector.shape_cast %1 : vector<8xf32> to vector<8x1xf32>
    %3 = vector.broadcast %2 : vector<8x1xf32> to vector<8x32xf32>
    %4 = arith.subf %0, %3 : vector<8x32xf32>
    %5 = math.exp %4 : vector<8x32xf32>
    %cst_1 = arith.constant dense<0.000000e+00> : vector<8xf32>
    %6 = vector.multi_reduction <add>, %5, %cst_1 [1] : vector<8x32xf32> to vector<8xf32>
    %7 = vector.shape_cast %6 : vector<8xf32> to vector<8x1xf32>
    %c0_2 = arith.constant 0 : index
    %c0_3 = arith.constant 0 : index
    %8 = vector.load %arg4[%c0_2, %c0_3] : memref<32x128xbf16, #tpu.memory_space<vmem>>, vector<32x128xbf16>
    %9 = arith.extf %8 : vector<32x128xbf16> to vector<32x128xf32>
    %cst_4 = arith.constant dense<0.000000e+00> : vector<8x128xf32>
    %10 = tpu.matmul %5, %9, %cst_4 {dimension_numbers = #tpu.dot_dimension_numbers<[1], [0], [0], [1], [0, 0, 1, 1], [], []>} : vector<8x32xf32>, vector<32x128xf32>, vector<8x128xf32> -> vector<8x128xf32>
    %11 = tpu.reciprocal %7 {approx = true} : vector<8x1xf32> -> vector<8x1xf32>
    %12 = arith.mulf %7, %11 : vector<8x1xf32>
    %cst_5 = arith.constant 2.000000e+00 : f32
    %13 = vector.broadcast %cst_5 : f32 to vector<8x1xf32>
    %14 = arith.subf %13, %12 : vector<8x1xf32>
    %15 = arith.mulf %11, %14 : vector<8x1xf32>
    %16 = vector.broadcast %15 : vector<8x1xf32> to vector<8x128xf32>
    %17 = arith.mulf %10, %16 : vector<8x128xf32>
    %cst_6 = arith.constant 0.000000e+00 : f32
    %18 = vector.broadcast %cst_6 : f32 to vector<8x128xf32>
    %19 = arith.subf %18, %17 : vector<8x128xf32>
    %c0_7 = arith.constant 0 : index
    %c0_8 = arith.constant 0 : index
    %20 = vector.load %arg2[%c0_7, %c0_8] : memref<8x16xf32, #tpu.memory_space<vmem>>, vector<8x16xf32>
    %c0_9 = arith.constant 0 : index
    %c0_10 = arith.constant 0 : index
    %21 = vector.load %arg3[%c0_9, %c0_10] : memref<16x128xf32, #tpu.memory_space<vmem>>, vector<16x128xf32>
    %22 = vector.extract_strided_slice %20 {offsets = [0, 0], sizes = [8, 1], strides = [1, 1]} : vector<8x16xf32> to vector<8x1xf32>
    %23 = vector.extract_strided_slice %20 {offsets = [0, 1], sizes = [8, 1], strides = [1, 1]} : vector<8x16xf32> to vector<8x1xf32>
    %24 = vector.extract_strided_slice %20 {offsets = [0, 2], sizes = [8, 1], strides = [1, 1]} : vector<8x16xf32> to vector<8x1xf32>
    %25 = vector.extract_strided_slice %20 {offsets = [0, 3], sizes = [8, 1], strides = [1, 1]} : vector<8x16xf32> to vector<8x1xf32>
    %26 = vector.extract_strided_slice %20 {offsets = [0, 4], sizes = [8, 1], strides = [1, 1]} : vector<8x16xf32> to vector<8x1xf32>
    %27 = vector.extract_strided_slice %20 {offsets = [0, 5], sizes = [8, 1], strides = [1, 1]} : vector<8x16xf32> to vector<8x1xf32>
    %28 = vector.extract_strided_slice %20 {offsets = [0, 6], sizes = [8, 1], strides = [1, 1]} : vector<8x16xf32> to vector<8x1xf32>
    %29 = vector.extract_strided_slice %20 {offsets = [0, 7], sizes = [8, 1], strides = [1, 1]} : vector<8x16xf32> to vector<8x1xf32>
    %30 = vector.extract_strided_slice %20 {offsets = [0, 8], sizes = [8, 1], strides = [1, 1]} : vector<8x16xf32> to vector<8x1xf32>
    %31 = vector.extract_strided_slice %21 {offsets = [0, 0], sizes = [1, 128], strides = [1, 1]} : vector<16x128xf32> to vector<1x128xf32>
    %32 = vector.extract_strided_slice %21 {offsets = [1, 0], sizes = [1, 128], strides = [1, 1]} : vector<16x128xf32> to vector<1x128xf32>
    %33 = vector.extract_strided_slice %21 {offsets = [2, 0], sizes = [1, 128], strides = [1, 1]} : vector<16x128xf32> to vector<1x128xf32>
    %34 = vector.extract_strided_slice %21 {offsets = [3, 0], sizes = [1, 128], strides = [1, 1]} : vector<16x128xf32> to vector<1x128xf32>
    %35 = vector.extract_strided_slice %21 {offsets = [4, 0], sizes = [1, 128], strides = [1, 1]} : vector<16x128xf32> to vector<1x128xf32>
    %36 = vector.extract_strided_slice %21 {offsets = [5, 0], sizes = [1, 128], strides = [1, 1]} : vector<16x128xf32> to vector<1x128xf32>
    %37 = vector.extract_strided_slice %21 {offsets = [6, 0], sizes = [1, 128], strides = [1, 1]} : vector<16x128xf32> to vector<1x128xf32>
    %38 = vector.extract_strided_slice %21 {offsets = [7, 0], sizes = [1, 128], strides = [1, 1]} : vector<16x128xf32> to vector<1x128xf32>
    %39 = vector.extract_strided_slice %21 {offsets = [8, 0], sizes = [1, 128], strides = [1, 1]} : vector<16x128xf32> to vector<1x128xf32>
    %40 = vector.broadcast %22 : vector<8x1xf32> to vector<8x128xf32>
    %41 = vector.broadcast %31 : vector<1x128xf32> to vector<8x128xf32>
    %42 = arith.subf %40, %41 : vector<8x128xf32>
    %43 = math.absf %42 : vector<8x128xf32>
    %44 = vector.broadcast %23 : vector<8x1xf32> to vector<8x128xf32>
    %45 = vector.broadcast %32 : vector<1x128xf32> to vector<8x128xf32>
    %46 = arith.subf %44, %45 : vector<8x128xf32>
    %47 = math.absf %46 : vector<8x128xf32>
    %48 = arith.addf %43, %47 : vector<8x128xf32>
    %49 = vector.broadcast %24 : vector<8x1xf32> to vector<8x128xf32>
    %50 = vector.broadcast %33 : vector<1x128xf32> to vector<8x128xf32>
    %51 = arith.subf %49, %50 : vector<8x128xf32>
    %52 = math.absf %51 : vector<8x128xf32>
    %53 = arith.addf %48, %52 : vector<8x128xf32>
    %54 = vector.broadcast %25 : vector<8x1xf32> to vector<8x128xf32>
    %55 = vector.broadcast %34 : vector<1x128xf32> to vector<8x128xf32>
    %56 = arith.subf %54, %55 : vector<8x128xf32>
    %57 = math.absf %56 : vector<8x128xf32>
    %58 = arith.addf %53, %57 : vector<8x128xf32>
    %59 = vector.broadcast %28 : vector<8x1xf32> to vector<8x128xf32>
    %60 = vector.broadcast %37 : vector<1x128xf32> to vector<8x128xf32>
    %61 = arith.minimumf %59, %60 : vector<8x128xf32>
    %62 = vector.broadcast %26 : vector<8x1xf32> to vector<8x128xf32>
    %63 = vector.broadcast %35 : vector<1x128xf32> to vector<8x128xf32>
    %64 = arith.maximumf %62, %63 : vector<8x128xf32>
    %65 = arith.subf %61, %64 : vector<8x128xf32>
    %cst_11 = arith.constant 0.000000e+00 : f32
    %66 = vector.broadcast %cst_11 : f32 to vector<8x128xf32>
    %67 = arith.maximumf %65, %66 : vector<8x128xf32>
    %68 = vector.broadcast %29 : vector<8x1xf32> to vector<8x128xf32>
    %69 = vector.broadcast %38 : vector<1x128xf32> to vector<8x128xf32>
    %70 = arith.minimumf %68, %69 : vector<8x128xf32>
    %71 = vector.broadcast %27 : vector<8x1xf32> to vector<8x128xf32>
    %72 = vector.broadcast %36 : vector<1x128xf32> to vector<8x128xf32>
    %73 = arith.maximumf %71, %72 : vector<8x128xf32>
    %74 = arith.subf %70, %73 : vector<8x128xf32>
    %cst_12 = arith.constant 0.000000e+00 : f32
    %75 = vector.broadcast %cst_12 : f32 to vector<8x128xf32>
    %76 = arith.maximumf %74, %75 : vector<8x128xf32>
    %77 = arith.mulf %67, %76 : vector<8x128xf32>
    %78 = vector.broadcast %30 : vector<8x1xf32> to vector<8x128xf32>
    %79 = vector.broadcast %39 : vector<1x128xf32> to vector<8x128xf32>
    %80 = arith.addf %78, %79 : vector<8x128xf32>
    %81 = arith.subf %80, %77 : vector<8x128xf32>
    %82 = vector.broadcast %28 : vector<8x1xf32> to vector<8x128xf32>
    %83 = vector.broadcast %37 : vector<1x128xf32> to vector<8x128xf32>
    %84 = arith.maximumf %82, %83 : vector<8x128xf32>
    %85 = vector.broadcast %26 : vector<8x1xf32> to vector<8x128xf32>
    %86 = vector.broadcast %35 : vector<1x128xf32> to vector<8x128xf32>
    %87 = arith.minimumf %85, %86 : vector<8x128xf32>
    %88 = arith.subf %84, %87 : vector<8x128xf32>
    %cst_13 = arith.constant 0.000000e+00 : f32
    %89 = vector.broadcast %cst_13 : f32 to vector<8x128xf32>
    %90 = arith.maximumf %88, %89 : vector<8x128xf32>
    %91 = vector.broadcast %29 : vector<8x1xf32> to vector<8x128xf32>
    %92 = vector.broadcast %38 : vector<1x128xf32> to vector<8x128xf32>
    %93 = arith.maximumf %91, %92 : vector<8x128xf32>
    %94 = vector.broadcast %27 : vector<8x1xf32> to vector<8x128xf32>
    %95 = vector.broadcast %36 : vector<1x128xf32> to vector<8x128xf32>
    %96 = arith.minimumf %94, %95 : vector<8x128xf32>
    %97 = arith.subf %93, %96 : vector<8x128xf32>
    %cst_14 = arith.constant 0.000000e+00 : f32
    %98 = vector.broadcast %cst_14 : f32 to vector<8x128xf32>
    %99 = arith.maximumf %97, %98 : vector<8x128xf32>
    %100 = arith.mulf %90, %99 : vector<8x128xf32>
    %cst_15 = arith.constant 9.99999996E-13 : f32
    %101 = vector.broadcast %cst_15 : f32 to vector<8x128xf32>
    %102 = arith.maximumf %81, %101 : vector<8x128xf32>
    %103 = tpu.reciprocal %102 {approx = true} : vector<8x128xf32> -> vector<8x128xf32>
    %104 = arith.mulf %102, %103 : vector<8x128xf32>
    %cst_16 = arith.constant 2.000000e+00 : f32
    %105 = vector.broadcast %cst_16 : f32 to vector<8x128xf32>
    %106 = arith.subf %105, %104 : vector<8x128xf32>
    %107 = arith.mulf %103, %106 : vector<8x128xf32>
    %cst_17 = arith.constant 9.99999996E-13 : f32
    %108 = vector.broadcast %cst_17 : f32 to vector<8x128xf32>
    %109 = arith.maximumf %100, %108 : vector<8x128xf32>
    %110 = tpu.reciprocal %109 {approx = true} : vector<8x128xf32> -> vector<8x128xf32>
    %111 = arith.mulf %109, %110 : vector<8x128xf32>
    %cst_18 = arith.constant 2.000000e+00 : f32
    %112 = vector.broadcast %cst_18 : f32 to vector<8x128xf32>
    %113 = arith.subf %112, %111 : vector<8x128xf32>
    %114 = arith.mulf %110, %113 : vector<8x128xf32>
    %115 = arith.mulf %77, %107 : vector<8x128xf32>
    %cst_19 = arith.constant 1.000000e+00 : f32
    %116 = vector.broadcast %cst_19 : f32 to vector<8x128xf32>
    %117 = arith.subf %116, %115 : vector<8x128xf32>
    %118 = arith.mulf %81, %114 : vector<8x128xf32>
    %119 = arith.subf %117, %118 : vector<8x128xf32>
    %cst_20 = arith.constant 1.000000e+00 : f32
    %120 = vector.broadcast %cst_20 : f32 to vector<8x128xf32>
    %121 = arith.mulf %120, %58 : vector<8x128xf32>
    %cst_21 = arith.constant 1.000000e+00 : f32
    %122 = vector.broadcast %cst_21 : f32 to vector<8x128xf32>
    %123 = arith.mulf %122, %19 : vector<8x128xf32>
    %124 = arith.addf %121, %123 : vector<8x128xf32>
    %cst_22 = arith.constant 1.000000e+00 : f32
    %125 = vector.broadcast %cst_22 : f32 to vector<8x128xf32>
    %126 = arith.mulf %125, %119 : vector<8x128xf32>
    %127 = arith.addf %124, %126 : vector<8x128xf32>
    %c0_23 = arith.constant 0 : index
    %c0_24 = arith.constant 0 : index
    %128 = vector.load %arg5[%c0_23, %c0_24] : memref<8x128xf32, #tpu.memory_space<vmem>>, vector<8x128xf32>
    tpu.vector_store %arg5[%c0_23, %c0_24], %127 {strides = array<i32>} : memref<8x128xf32, #tpu.memory_space<vmem>>, vector<8x128xf32>,
    return
  }
  func.func @transform_0(%arg0: i32) -> (i32, i32) {
    %c0_i32 = arith.constant 0 : i32
    %c0_i32_0 = arith.constant 0 : i32
    return %arg0, %c0_i32 : i32, i32
  }
  func.func @transform_1(%arg0: i32) -> (i32, i32) {
    %c0_i32 = arith.constant 0 : i32
    %c0_i32_0 = arith.constant 0 : i32
    return %arg0, %c0_i32 : i32, i32
  }
  func.func @transform_2(%arg0: i32) -> (i32, i32) {
    %c0_i32 = arith.constant 0 : i32
    %c0_i32_0 = arith.constant 0 : i32
    %c0_i32_1 = arith.constant 0 : i32
    return %c0_i32, %c0_i32_0 : i32, i32
  }
  func.func @transform_3(%arg0: i32) -> (i32, i32) {
    %c0_i32 = arith.constant 0 : i32
    %c0_i32_0 = arith.constant 0 : i32
    %c0_i32_1 = arith.constant 0 : i32
    return %c0_i32, %c0_i32_0 : i32, i32
  }
  func.func @transform_4(%arg0: i32) -> (i32, i32) {
    %c0_i32 = arith.constant 0 : i32
    %c0_i32_0 = arith.constant 0 : i32
    return %arg0, %c0_i32 : i32, i32
  }
}

</mosaic_0001>

<bundles_post_ra>
// kernel: tpu_custom_call.1
= control target key start
LH: loop header
LB: loop body
LE: loop exit
PB: predicated region body
PF: predicated region fallthrough
CT: control target
= control target key end

     0   :  { %s1232_s0 = inlined_call_operand.hbm [shape: f32[16,32], index: 0, kind: input, shape index: {}]   ;;  %s1233_s1 = inlined_call_operand.hbm [shape: f32[16,16], index: 1, kind: input, shape index: {}]   ;;  %s1234_s2 = inlined_call_operand.hbm [shape: f32[16,128], index: 2, kind: input, shape index: {}]   ;;  %s1235_s3 = inlined_call_operand.hbm [shape: bf16[32,128], index: 3, kind: input, shape index: {}]   ;;  %s1236_s4 = inlined_call_operand.hbm [shape: f32[16,128], index: 4, kind: output, shape index: {}]  }
   0x1   :  { %1241 = sst [smem:[#allocation16_spill]] %s1234_s2 }
   0x2   :  { %9 = vsyncpa [#allocation3], 0 }
   0x3   :  { %11 = vsyncpa [#allocation3 + $0x1], 0 }
   0x4   :  { %12 = vsyncpa [#allocation6], 0 }
   0x5   :  { %14 = vsyncpa [#allocation6 + $0x1], 0 }
   0x6   :  { %15 = vsyncpa [#allocation9], 0 }
   0x7   :  { %16 = vsyncpa [#allocation4], 0 }
   0x8   :  { %18 = vsyncpa [#allocation4 + $0x1], 0  ;;  %s1008_s15 = smov 0   ;;  %s1010_s16 = smov 0  }
   0x9   :  { %s1012_s17 = smov 0   ;;  %s1014_s18 = smov 0  }
   0xa LB: > { %s1029_s19 = sadd.s32 4294967295, %s961_s18   ;;  %s627_s20 = sadd.s32 4294967294, %s961_s18   ;;  %s961_s18 = sphi %s1014_s18, %s1262_s18   ;;  %s957_s17 = sphi %s1012_s17, %s1261_s17   ;;  %s953_s16 = sphi %s1010_s16, %s1260_s16   ;;  %s949_s15 = sphi %s1008_s15, %s1259_s15  }
   0xb   : > { %p44_p0 = scmp.ne.s32.totalorder %s953_s16, %s949_s15  ;;  %p1237_p1 = scmp.eq.s32.totalorder %s1029_s19, 0 }
   0xc   : > { %p142_p3 = scmp.eq.s32.totalorder %s627_s20, 1  ;;  %p628_p5 = scmp.ge.s32.totalorder %s961_s18, 1 }
   0xd   : > { %p1038_p4 = por %p1237_p1, %p44_p0  ;;  %p149_p7 = scmp.lt.s32.totalorder %s961_s18, 3 }
   0xe   : > { %p1043_p6 = por %p142_p3, %p44_p0  ;;  %s963_s24 = smov [#allocation7]  }
   0xf   : > { %s1242_s21 = scalar_select %p1038_p4, 1, 0 }
  0x10   : > { %s1243_s22 = scalar_select %p1043_p6, 1, 0 }
  0x11   : > { %p1048_p8 = pnand %p628_p5, %p149_p7  ;;  %s161_s25 = sshll.u32 %s963_s24, 4  ;;  %s162_s25 = int_to_ptr.vmem [resolvable:$true] %s161_s25 }
  0x12   : > { %s964_s27 = smov [#allocation8]   ;;  %s788_s29 = scalar_lea.vmem %s162_s25, 256 }
  0x13   : > { %s1244_s23 = scalar_select %p1048_p8, 1, 0 }
  0x14   : > { %p686_p9 = pneg %p1048_p8  ;;  %s174_s28 = sshll.u32 %s964_s27, 4  ;;  %s175_s28 = int_to_ptr.vmem [resolvable:$true] %s174_s28 }
  0x15   : > { %p789_p13 = scmp.ne.s32.totalorder %s162_s25, %s788_s29  ;;  %p796_p5 = scmp.lt.s32.totalorder %s162_s25, %s162_s25 }
  0x16   : > { %p1057_p11 = pnand %p686_p9, %p1237_p1  ;;  %p797_p7 = scmp.lt.s32.totalorder %s788_s29, %s788_s29 }
  0x18   : > { %p779_p12 = pneg %p1057_p11  ;;  %p798_p10 = por %p797_p7, %p796_p5 }
  0x1a   : > { %p791_p0 = pnand %p789_p13, %p779_p12 }
  0x1c   : > { %p792_p3 = pneg %p791_p0 }
  0x1e   : > { %p799_p9 = pnand %p798_p10, %p792_p3 }
  0x20   : > { %802 = shalt.err (!%p799_p9)
}
  0x21   : > { %s965_s30 = smov 128   ;;  %s966_s5 = smov 8  }
  0x22   : > { %s1246_s2 = sld [smem:[#allocation16_spill]]  ;;  %s814_s8 = scalar_lea.vmem %s175_s28, 256 }
  0x23   : > { %p815_p1 = scmp.ne.s32.totalorder %s175_s28, %s814_s8  ;;  %p822_p2 = scmp.lt.s32.totalorder %s175_s28, %s175_s28 }
  0x24   : > { %p823_p6 = scmp.lt.s32.totalorder %s814_s8, %s814_s8 }
  0x25   : > { %p817_p13 = pnand %p815_p1, %p779_p12 }
  0x26   : > { %p824_p5 = por %p823_p6, %p822_p2 }
  0x27   : > { %p818_p0 = pneg %p817_p13 }
  0x28   : > { %689 = dma.hbm_to_vmem [thread:$0]  (!%p1057_p11), %s1246_s2, 256, %s162_s25, [#allocation6], %s965_s30, %s965_s30, %s966_s5  }
  0x29   : > { %p825_p10 = pnand %p824_p5, %p818_p0 }
  0x2b   : > { %828 = shalt.err (!%p825_p10)
}
  0x2c   : > { %s967_s9 = smov 64   ;;  %s968_s10 = smov 4  }
  0x2d   : > { %692 = dma.hbm_to_vmem [thread:$0]  (!%p1057_p11), %s1235_s3, 256, %s175_s28, [#allocation9], %s967_s9, %s967_s9, %s968_s10  }
  0x2e   : > { %s1080_s13 = sadd.s32 1, %s961_s18   ;;  %s31_s20 = sadd.s32 1, %s957_s17 }
  0x2f   : > { %s28_s14 = ssub.s32 %s961_s18, %s1080_s13  ;;  %p38_p2 = scmp.ne.s32.totalorder %s957_s17, %s953_s16 }
  0x30   : > { %p29_p1 = scmp.eq.s32.totalorder %s28_s14, 0  ;;  %p39_p6 = scmp.eq.s32.totalorder %s961_s18, 0 }
  0x31   : > { %p1247_p3 = scmp.eq.s32.totalorder %s1029_s19, 1  ;;  %p706_p9 = scmp.lt.s32.totalorder %s961_s18, 2 }
  0x32   : > { %s1089_s24 = scalar_select %p29_p1, %s957_s17, %s31_s20  }
  0x33   : > { %p40_p12 = por %p39_p6, %p38_p2  ;;  %p1093_p7 = por %p1247_p3, %p38_p2 }
  0x34   : > { %s188_s26 = sand.u32 1, %s957_s17   ;;  %s633_s28 = sshll.u32 %s961_s18, 7 }
  0x35   : > { %s1248_s25 = scalar_select %p1093_p7, 1, 0 }
  0x36   : > { %s1099_s27 = sshll.u32 %s188_s26, 3  ;;  %s1105_s5 = scalar_lea.hbm %s1232_s0, %s633_s28 }
  0x37   : > { %s192_s6 = scalar_lea.vmem [#allocation2], %s1099_s27  ;;  %p1110_p11 = pnand %p706_p9, %p40_p12 }
  0x38   : > { %s199_s7 = sshll.u32 %s192_s6, 4  ;;  %s1117_s11 = scalar_lea.hbm %s1233_s1, %s633_s28  ;;  %s1108_s7 = int_to_ptr.vmem [resolvable:$true] %s199_s7 }
  0x39   : > { %s206_s12 = sand.u32 1, %s961_s18   ;;  %s189_s14 = scalar_lea.sflag [#allocation3], %s188_s26 }
  0x3a   : > { %s829_s20 = scalar_lea.hbm %s1105_s5, 128  ;;  %p831_p0 = pneg %p1110_p11 }
  0x3b   : > { %p830_p13 = scmp.ne.s32.totalorder %s1105_s5, %s829_s20  ;;  %s834_s6 = scalar_lea.hbm %s1232_s0, 256 }
  0x3c   : > { %p835_p1 = scmp.lt.s32.totalorder %s1105_s5, %s1232_s0  ;;  %p836_p2 = scmp.lt.s32.totalorder %s834_s6, %s829_s20 }
  0x3d   : > { %p832_p5 = pnand %p831_p0, %p830_p13 }
  0x3e   : > { %p837_p6 = por %p836_p2, %p835_p1 }
  0x3f   : > { %p833_p10 = pneg %p832_p5 }
  0x41   : > { %p838_p12 = pnand %p837_p6, %p833_p10 }
  0x43   : > { %841 = shalt.err (!%p838_p12)
}
  0x44   : > { %s842_s26 = scalar_lea.vmem %s1108_s7, 128  ;;  %s969_s28 = smov [#allocation2]  }
  0x45   : > { %p843_p3 = scmp.ne.s32.totalorder %s1108_s7, %s842_s26  ;;  %s847_s10 = sshll.u32 %s969_s28, 4  ;;  %s848_s10 = int_to_ptr.vmem [resolvable:$false] %s847_s10 }
  0x46   : > { %s849_s29 = scalar_lea.vmem %s848_s10, 256  ;;  %p850_p5 = scmp.lt.s32.totalorder %s1108_s7, %s848_s10 }
  0x47   : > { %p845_p9 = pnand %p843_p3, %p831_p0  ;;  %p851_p7 = scmp.lt.s32.totalorder %s849_s29, %s842_s26 }
  0x49   : > { %p846_p13 = pneg %p845_p9  ;;  %p852_p4 = por %p851_p7, %p850_p5 }
  0x4b   : > { %p853_p1 = pnand %p852_p4, %p846_p13 }
  0x4d   : > { %856 = shalt.err (!%p853_p1)
}
  0x4e   : > { %696 = dma.hbm_to_vmem [thread:$0]  (!%p1110_p11), %s1105_s5, 128, %s1108_s7, %s189_s14  }
  0x4f   : > { %s210_s2 = scalar_lea.vmem [#allocation5], %s1099_s27  ;;  %s207_s30 = scalar_lea.sflag [#allocation6], %s206_s12 }
  0x50   : > { %s217_s20 = sshll.u32 %s210_s2, 4  ;;  %s857_s6 = scalar_lea.hbm %s1117_s11, 128  ;;  %s218_s20 = int_to_ptr.vmem [resolvable:$true] %s217_s20 }
  0x51   : > { %p858_p7 = scmp.ne.s32.totalorder %s1117_s11, %s857_s6  ;;  %s862_s28 = scalar_lea.hbm %s1233_s1, 256 }
  0x52   : > { %p863_p2 = scmp.lt.s32.totalorder %s1117_s11, %s1233_s1  ;;  %p864_p6 = scmp.lt.s32.totalorder %s862_s28, %s857_s6 }
  0x53   : > { %p860_p4 = pnand %p858_p7, %p831_p0 }
  0x54   : > { %p865_p12 = por %p864_p6, %p863_p2 }
  0x55   : > { %p861_p10 = pneg %p860_p4 }
  0x57   : > { %p866_p3 = pnand %p865_p12, %p861_p10 }
  0x59   : > { %869 = shalt.err (!%p866_p3)
}
  0x5a   : > { %s870_s27 = scalar_lea.vmem %s218_s20, 128  ;;  %s970_s5 = smov [#allocation5]  }
  0x5b   : > { %p871_p9 = scmp.ne.s32.totalorder %s218_s20, %s870_s27  ;;  %s875_s7 = sshll.u32 %s970_s5, 4  ;;  %s876_s7 = int_to_ptr.vmem [resolvable:$false] %s875_s7 }
  0x5c   : > { %s877_s12 = scalar_lea.vmem %s876_s7, 256  ;;  %p878_p1 = scmp.lt.s32.totalorder %s218_s20, %s876_s7 }
  0x5d   : > { %p873_p13 = pnand %p871_p9, %p831_p0  ;;  %p879_p7 = scmp.lt.s32.totalorder %s877_s12, %s870_s27 }
  0x5f   : > { %p874_p5 = pneg %p873_p13  ;;  %p880_p4 = por %p879_p7, %p878_p1 }
  0x61   : > { %p881_p8 = pnand %p880_p4, %p874_p5 }
  0x63   : > { %884 = shalt.err (!%p881_p8)
}
  0x64   : > { %699 = dma.hbm_to_vmem [thread:$0]  (!%p1110_p11), %s1117_s11, 128, %s218_s20, %s207_s30  }
  0x65   : > { %p1250_p10 = scmp.ne.s32.totalorder %s1244_s23, 0 }
  0x66   : > { %s1168_s14 = sand.u32 (!%p1250_p10), 1, %s953_s16   ;;  %p1251_p0 = scmp.ne.s32.totalorder (!%p1250_p10), %s1242_s21, 0 }
  0x67   : > { %226 = sbr.rel (%p1250_p10) target bundleno = 490 (0x1ea), region = 36  ;;  %s1171_s2 = sshll.u32 (!%p1250_p10), %s1168_s14, 3 }
  0x68   : > { %s229_s6 = scalar_lea.sflag (!%p1250_p10), [#allocation3], %s1168_s14  ;;  %s232_s9 = scalar_lea.vmem (!%p1250_p10), [#allocation2], %s1171_s2 }
  0x6c   : > { %928 = dma.done.wait (%p1251_p0), %s229_s6, 128  }
  0x6d   : > { %930 = vsyncadd (%p1251_p0), %s229_s6, 4294967168  ;;  %s237_s23 = sand.u32 1, %s1029_s19   ;;  %s241_s11 = scalar_lea.vmem [#allocation5], %s1171_s2 }
  0x6e   : > { %s238_s8 = scalar_lea.sflag [#allocation6], %s237_s23 }
  0x6f   : > { %932 = dma.done.wait (%p1251_p0), %s238_s8, 128  }
  0x70   : > { %934 = vsyncadd (%p1251_p0), %s238_s8, 4294967168  ;;  %p1252_p8 = scmp.eq.s32.totalorder %s1029_s19, 0 }
  0x72   : > { %936 = dma.done.wait (%p1252_p8), [#allocation6], 256   ;;  %p1253_p11 = pmov %p1252_p8 }
  0x73   : > { %p1254_p2 = pmov %p1252_p8 }
  0x74   : > { %938 = vsyncadd (%p1253_p11), [#allocation6], 4294967040 }
  0x75   : > { %940 = dma.done.wait (%p1254_p2), [#allocation9], 256   ;;  %p1255_p6 = pmov %p1254_p2 }
  0x76   : > { %v971_v0 = vmov 4   ;;  %v972_v1 = vmov 6   ;;  %vm280_vm0 = vcmask 261120   ;;  %v279_v2 = vld [vmem:[%s232_s9] sm:$0xff]  ;;  %v377_v3 = vld [vmem:[%s241_s11] sm:$0xff]  ;;  %v973_v5 = vmov 7  }
  0x77   : > { %942 = vsyncadd (%p1255_p6), [#allocation9], 4294967040  ;;  %760 = vset.pattern.permute.xlu1 %v971_v0  ;;  %759 = vset.pattern.permute.xlu0 %v972_v1  ;;  %v281_v4 = vsel %vm280_vm0, %v279_v2, -inf  ;;  %v974_v6 = vmov 5   ;;  %v975_v7 = vmov 0   ;;  %v655_v8 = vld [vmem:[#allocation8 + $0x8] sm:$0xff]   ;;  %v385_v24 = vlaneseq }
  0x78   : > { %434 = vperm.xlu1 %760, %v377_v3   ;;  %282 = vmax.xlane.f32.xlu0 %v281_v4  ;;  %v648_v9 = vld [vmem:[#allocation8] sm:$0xff]   ;;  %v976_v10 = vmov 0.0   ;;  %v653_v11 = vunpack.c.l.bf16 %v655_v8  ;;  %v654_v12 = vunpack.c.h.bf16 %v655_v8  ;;  %vm977_vm1 = vmmov 0   ;;  %v378_v32 = vld [vmem:[#allocation7] sm:$0xff]  ;;  %v379_v46 = vld [vmem:[#allocation7 + $0x8] sm:$0xff]  ;;  %s644_s21 = sshll.u32 %s1029_s19, 7 }
  0x79   : > { %661 = vmatprep.subr.mxu0 %v976_v10  ;;  %669 = vmatprep.mubr.msk.f32.mxu0 %vm977_vm1, %v976_v10  ;;  %v650_v13 = vunpack.c.h.bf16 %v648_v9  ;;  %v649_v14 = vunpack.c.l.bf16 %v648_v9  ;;  %v978_v15 = vmov 8   ;;  %v979_v16 = vmov 3   ;;  %s278_s20 = scalar_lea.vmem [#allocation10], %s1171_s2  ;;  %s513_s10 = scalar_lea.hbm %s1236_s4, %s644_s21 }
  0x7a   : > { %662 = vmatpush3.msra.mxu0 %v654_v12  ;;  %v980_v17 = vmov 1   ;;  %v981_v18 = vmov 2   ;;  %v386_v26 = vshrl.u32 %v385_v24, 7  ;;  %s515_s30 = sshll.u32 %s278_s20, 4  ;;  %s502_s29 = scalar_lea.sflag [#allocation4], %s1168_s14  ;;  %s516_s30 = int_to_ptr.vmem [resolvable:$true] %s515_s30 }
  0x7b   : > { %663 = vmatprep.subr.mxu0 %v976_v10  ;;  %s885_s27 = scalar_lea.vmem %s516_s30, 128  ;;  %p1256_p3 = scmp.ne.s32.totalorder %s1248_s25, 0 }
  0x7c   : > { %761 = vset.pattern.permute.xlu1 %v973_v5  ;;  %664 = vmatpush3.msra.mxu0 %v653_v11  ;;  %v439_v28 = vsub.s32 4, %v386_v26  ;;  %v450_v29 = vsub.s32 7, %v386_v26  ;;  %v459_v30 = vsub.s32 5, %v386_v26  ;;  %v430_v31 = vsub.s32 6, %v386_v26  ;;  %p886_p12 = scmp.ne.s32.totalorder %s516_s30, %s885_s27  ;;  %s982_s5 = smov [#allocation10]  }
  0x7d   : > { %445 = vperm.xlu1 %761, %v377_v3   ;;  %665 = vmatprep.subr.mxu0 %v976_v10  ;;  %v387_v43 = vsub.s32 0, %v386_v26  ;;  %v408_v9 = vsub.s32 2, %v386_v26  ;;  %v419_v11 = vsub.s32 3, %v386_v26  ;;  %s889_s7 = sshll.u32 %s982_s5, 4  ;;  %s890_s7 = int_to_ptr.vmem [resolvable:$false] %s889_s7 }
  0x7e   : > { %666 = vmatpush3.msra.mxu0 %v650_v13  ;;  %v440_v33 = vrot.slane %v378_v32, %v439_v28  ;;  %v451_v34 = vrot.slane %v378_v32, %v450_v29  ;;  %v460_v35 = vrot.slane %v378_v32, %v459_v30  ;;  %v431_v36 = vrot.slane %v378_v32, %v430_v31  ;;  %p887_p9 = pnand %p886_p12, %p1256_p3  ;;  %s891_s19 = scalar_lea.vmem %s890_s7, 256 }
  0x7f   : > { %667 = vmatprep.subr.mxu0 %v976_v10  ;;  %v472_v49 = vrot.slane %v379_v46, %v387_v43  ;;  %p892_p5 = scmp.lt.s32.totalorder %s516_s30, %s890_s7  ;;  %p893_p1 = scmp.lt.s32.totalorder %s891_s19, %s885_s27 }
  0x80   : > { %668 = vmatpush3.msra.mxu0 %v649_v14  ;;  %p888_p13 = pneg %p887_p9 }
  0x81   : > { %762 = vset.pattern.permute.xlu1 %v974_v6  ;;  %v388_v6 = vrot.slane %v378_v32, %v387_v43  ;;  %p894_p7 = por %p893_p1, %p892_p5 }
  0x82   : > { %454 = vperm.xlu1 %762, %v377_v3  }
  0x83   : > { %p895_p4 = pnand %p894_p7, %p888_p13 }
  0x86   : > { %764 = vset.pattern.permute.xlu1 %v975_v7 }
  0x87   : > { %382 = vperm.xlu1 %764, %v377_v3  }
  0x8b   : > { %767 = vset.pattern.permute.xlu1 %v979_v16 }
  0x8e   : > { %425 = vperm.xlu0 %759, %v377_v3  }
  0x92   : > { %763 = vset.pattern.permute.xlu0 %v978_v15 }
  0x93   : > { %466 = vperm.xlu0 %763, %v377_v3  }
  0x97   : > { %765 = vset.pattern.permute.xlu0 %v980_v17  ;;  %v409_v17 = vrot.slane %v378_v32, %v408_v9 }
  0x98   : > { %392 = vperm.xlu0 %765, %v377_v3  }
  0x9c   : > { %766 = vset.pattern.permute.xlu0 %v981_v18 }
  0x9d   : > { %403 = vperm.xlu0 %766, %v377_v3  }
  0xa1   : > { %768 = vset.pattern.permute.xlu0 %v978_v15 }
  0xf3   : > { %v435_v25 = vpop.permute.xlu1 %434 }
  0xf4   : > { %v441_v39 = vmax.f32 %v435_v25, %v440_v33  ;;  %v476_v47 = vmin.f32 %v435_v25, %v440_v33 }
  0xf8   : > { %v446_v27 = vpop.permute.xlu1 %445 }
  0xf9   : > { %v452_v40 = vmin.f32 %v446_v27, %v451_v34  ;;  %v479_v48 = vmax.f32 %v446_v27, %v451_v34 }
  0xfd   : > { %v455_v37 = vpop.permute.xlu1 %454 }
  0xfe   : > { %v461_v41 = vmax.f32 %v455_v37, %v460_v35  ;;  %v480_v51 = vmin.f32 %v455_v37, %v460_v35 }
 0x100   : > { %v462_v44 = vsub.f32 %v452_v40, %v461_v41  ;;  %v481_v55 = vsub.f32 %v479_v48, %v480_v51 }
 0x101   : > { %v283_v19 = vpop.xlane.xlu0 %282 }
 0x102   : > { %v284_v20 = vsub.f32 %v279_v2, %v283_v19  ;;  %v463_v50 = vmax.f32 %v462_v44, 0.0  ;;  %v482_v59 = vmax.f32 %v481_v55, 0.0  ;;  %v383_v0 = vpop.permute.xlu1 %382 }
 0x103   : > { %v389_v13 = vsub.f32 %v383_v0, %v388_v6 }
 0x104   : > { %v285_v21 = vmul.f32 1.442695, %v284_v20  ;;  %v420_v20 = vrot.slane %v378_v32, %v419_v11 }
 0x106   : > { %769 = vpow2.f32 %v285_v21  ;;  %v390_v21 = vand.u32 2147483647, %v389_v13 }
 0x109   : > { %v426_v38 = vpop.permute.xlu0 %425 }
 0x10a   : > { %v432_v42 = vmin.f32 %v426_v38, %v431_v36  ;;  %v475_v53 = vmax.f32 %v426_v38, %v431_v36 }
 0x10c   : > { %v442_v45 = vsub.f32 %v432_v42, %v441_v39  ;;  %v477_v56 = vsub.f32 %v475_v53, %v476_v47 }
 0x10e   : > { %v443_v52 = vmax.f32 %v442_v45, 0.0  ;;  %v467_v54 = vpop.permute.xlu0 %466  ;;  %v478_v60 = vmax.f32 %v477_v56, 0.0 }
 0x10f   : > { %v473_v58 = vadd.f32 %v472_v49, %v467_v54 }
 0x110   : > { %v464_v57 = vmul.f32 %v463_v50, %v443_v52  ;;  %v483_v62 = vmul.f32 %v482_v59, %v478_v60 }
 0x112   : > { %v474_v61 = vsub.f32 %v473_v58, %v464_v57  ;;  %v489_v1 = vmax.f32 %v483_v62, 1e-12 }
 0x113   : > { %v770_v22 = vpop.eup %769  ;;  %v393_v5 = vpop.permute.xlu0 %392 }
 0x114   : > { %670 = vmatmul.mubr.msk.f32.vlgmr.msra.gmra.mxu0 %vm280_vm0, %v770_v22  ;;  %v287_v23 = vsel %vm280_vm0, %v770_v22, 0.0  ;;  %v484_v63 = vmax.f32 %v474_v61, 1e-12 }
 0x115   : > { %288 = vadd.xlane.f32.xlu1 %v287_v23 }
 0x116   : > { %771 = vrcp.f32 %v484_v63 }
 0x117   : > { %773 = vrcp.f32 %v489_v1 }
 0x118   : > { %v404_v18 = vpop.permute.xlu0 %403 }
 0x119   : > { %v410_v27 = vsub.f32 %v404_v18, %v409_v17 }
 0x11b   : > { %v411_v33 = vand.u32 2147483647, %v410_v27 }
 0x123   : > { %v772_v4 = vpop.eup %771 }
 0x124   : > { %v486_v7 = vmul.f32 %v772_v4, %v484_v63  ;;  %v774_v10 = vpop.eup %773 }
 0x125   : > { %v491_v14 = vmul.f32 %v774_v10, %v489_v1 }
 0x126   : > { %414 = vperm.xlu1 %767, %v377_v3   ;;  %v397_v3 = vsub.s32 1, %v386_v26  ;;  %v487_v15 = vsub.f32 2.0, %v486_v7 }
 0x127   : > { %v492_v23 = vsub.f32 2.0, %v491_v14 }
 0x128   : > { %v398_v8 = vrot.slane %v378_v32, %v397_v3  ;;  %v488_v24 = vmul.f32 %v772_v4, %v487_v15 }
 0x129   : > { %v493_v26 = vmul.f32 %v774_v10, %v492_v23 }
 0x12a   : > { %v399_v16 = vsub.f32 %v393_v5, %v398_v8  ;;  %v494_v30 = vmul.f32 %v488_v24, %v464_v57 }
 0x12b   : > { %v496_v32 = vmul.f32 %v493_v26, %v474_v61 }
 0x12c   : > { %v400_v25 = vand.u32 2147483647, %v399_v16  ;;  %v495_v37 = vsub.f32 1.0, %v494_v30 }
 0x12e   : > { %v401_v31 = vadd.f32 %v400_v25, %v390_v21  ;;  %v497_v43 = vsub.f32 %v495_v37, %v496_v32 }
 0x130   : > { %v412_v38 = vadd.f32 %v411_v33, %v401_v31 }
 0x19e   : > { %v289_v2 = vpop.xlane.xlu1 %288 }
 0x19f   : > { %775 = vrcp.f32 %v289_v2 }
 0x1a2   : > { %v415_v22 = vpop.permute.xlu1 %414 }
 0x1a3   : > { %v421_v29 = vsub.f32 %v415_v22, %v420_v20 }
 0x1a5   : > { %v422_v34 = vand.u32 2147483647, %v421_v29 }
 0x1a7   : > { %v423_v41 = vadd.f32 %v422_v34, %v412_v38 }
 0x1ac   : > { %v776_v12 = vpop.eup %775 }
 0x1ad   : > { %v372_v19 = vmul.f32 %v776_v12, %v289_v2 }
 0x1af   : > { %v373_v28 = vsub.f32 2.0, %v372_v19 }
 0x1b1   : > { %v374_v35 = vmul.f32 %v776_v12, %v373_v28 }
 0x1d4   : > { %v367_v36 = vpop.f32.mrf.mxu0 }
 0x1d5   : > { %v375_v39 = vmul.f32 %v374_v35, %v367_v36 }
 0x1d6   : > { %v671_v40 = vpop.f32.mrf.mxu0 }
 0x1d7   : > { %v376_v42 = vsub.f32 0.0, %v375_v39 }
 0x1d9   : > { %v498_v44 = vadd.f32 %v423_v41, %v376_v42 }
 0x1db   : > { %v499_v45 = vadd.f32 %v498_v44, %v497_v43 }
 0x1dd   : > { %500 = vst [vmem:[%s278_s20] sm:$0xff] %v499_v45 }
 0x1de   : > { %898 = shalt.err (!%p895_p4)
}
 0x1df   : > { %s899_s12 = scalar_lea.hbm %s513_s10, 128  ;;  %s903_s6 = scalar_lea.hbm %s1236_s4, 256 }
 0x1e0   : > { %p900_p10 = scmp.ne.s32.totalorder %s513_s10, %s899_s12  ;;  %p904_p11 = scmp.lt.s32.totalorder %s513_s10, %s1236_s4 }
 0x1e1   : > { %p905_p2 = scmp.lt.s32.totalorder %s903_s6, %s899_s12 }
 0x1e2   : > { %p901_p0 = pnand %p900_p10, %p1256_p3 }
 0x1e3   : > { %p906_p6 = por %p905_p2, %p904_p11 }
 0x1e4   : > { %p902_p8 = pneg %p901_p0 }
 0x1e6   : > { %p907_p12 = pnand %p906_p6, %p902_p8 }
 0x1e8   : > { %910 = shalt.err (!%p907_p12)
}
 0x1e9   : > { %684 = dma.vmem_to_hbm [thread:$0]  (%p1256_p3), %s516_s30, 128, %s513_s10, %s502_s29  }
 0x1ea PF: > { %s527_s8 = sand.u32 1, %s949_s15   ;;  %p1257_p9 = scmp.ne.s32.totalorder %s1243_s22, 0 }
 0x1eb   : > { %p1258_p13 = scmp.ge.s32.totalorder %s961_s18, 2  ;;  %s528_s11 = scalar_lea.sflag [#allocation4], %s527_s8 }
 0x1ed   : > { %p701_p5 = pnand %p1258_p13, %p1257_p9 }
 0x1ef   : > { %p702_p1 = pneg %p701_p5 }
 0x1f1   : > { %944 = dma.done.wait (%p702_p1), %s528_s11, 128  }
 0x1f2   : > { %946 = vsyncadd (%p702_p1), %s528_s11, 4294967168  ;;  %p21_p7 = scmp.ge.s32.totalorder %s1080_s13, 4   ;;  %s1259_s15 = smov %s953_s16 }
 0x1f3   : > { %s1260_s16 = smov %s957_s17  ;;  %s1261_s17 = smov %s1089_s24 }
 0x1f4   : > { %s1262_s18 = smov %s1080_s13  ;;  %23 = sbr.rel (!%p21_p7) target bundleno = 10 (0xa), region = 102 }
 0x1f9   :  { %533 = vsyncpa [#allocation3], 1 }
 0x1fa   :  { %535 = vsyncpa [#allocation3 + $0x1], 1 }
 0x1fb   :  { %536 = vsyncpa [#allocation6], 1 }
 0x1fc   :  { %538 = vsyncpa [#allocation6 + $0x1], 1 }
 0x1fd   :  { %539 = vsyncpa [#allocation9], 1 }
 0x1fe   :  { %540 = vsyncpa [#allocation4], 1 }
 0x1ff   :  { %542 = vsyncpa [#allocation4 + $0x1], 1 }

</bundles_post_ra>
